<compile_context>
chip_gen: v7x
topology: tpu7x:2x2x1
jax: 0.10.0
libtpu: 0.0.40
codegen_flags: <defaults>
</compile_context>

<pallas_src>
import jax
import jax.numpy as jnp
import numpy as np
from jax.experimental import pallas as pl
from jax.experimental.pallas import tpu as pltpu

HIDDEN_SIZE = 16
INPUT_SIZE = 2
NUM_LAYERS = 1


def gru_kernel(x_ref, wih_ref, whh_ref, bg_ref, bhn_ref, out_ref):
    """Whole-sequence GRU forward in one invocation.

    x_ref   : (T*B, I)    input sequence, flattened in the wrapper (VMEM)
    wih_ref : (I, 3H)     [W_ir | W_iz | W_in] stacked along lanes
    whh_ref : (H, 3H)     [W_hr | W_hz | W_hn] stacked along lanes
    bg_ref  : (1, 3H)     [b_ir+b_hr | b_iz+b_hz | b_in]
    bhn_ref : (1, H)      b_hn (kept separate: it sits inside the r*(...) term)
    out_ref : (B, T*H)    lane-dense hidden-state slab; column block t*H:(t+1)*H
                          holds h_t.  Unpacked to (T, B, H) in the wrapper.
    """
    B, TH = out_ref.shape
    H = whh_ref.shape[0]
    T = TH // H

    # Input-side gate pre-activations for ALL timesteps: one batched matmul,
    # off the recurrence critical path.  bf16 operands, f32 accumulate.
    gi_all = (jnp.dot(x_ref[...].astype(jnp.bfloat16),
                      wih_ref[...].astype(jnp.bfloat16),
                      preferred_element_type=jnp.float32)
              + bg_ref[...])                                    # (T*B, 3H) f32

    w_hh = whh_ref[...].astype(jnp.bfloat16)            # hoisted: cast once
    b_hn = jnp.broadcast_to(bhn_ref[...], (B, H))       # hoisted: one broadcast

    h = jnp.zeros((B, H), jnp.float32)
    outs = []
    for t in range(T):        # T is static (=8); fully unrolled recurrence
        gh = jnp.dot(h.astype(jnp.bfloat16), w_hh,
                     preferred_element_type=jnp.float32)        # (B, 3H) f32
        gi = gi_all[t * B:(t + 1) * B, :]                       # static row slice
        r = jax.nn.sigmoid(gi[:, 0:H] + gh[:, 0:H])
        z = jax.nn.sigmoid(gi[:, H:2 * H] + gh[:, H:2 * H])
        n = jnp.tanh(gi[:, 2 * H:] + r * (gh[:, 2 * H:] + b_hn))
        h = (1.0 - z) * n + z * h
        outs.append(h)

    # One lane-dense (B, T*H) = (4, 128) store: a single aligned vreg write.
    out_ref[...] = jnp.concatenate(outs, axis=-1).astype(out_ref.dtype)


def gru_encoder(x, w_ih, w_hh, b_ih, b_hh):
    """x: (T, B, I). Weights stacked per gate (r, z, n). Returns (outputs, h_n)."""
    T, B, I = x.shape
    H = w_ih.shape[-1]

    # One-time (outside the recurrence) weight / bias repacking:
    w_ih_s = jnp.concatenate([w_ih[0], w_ih[1], w_ih[2]], axis=-1)   # (I, 3H)
    w_hh_s = jnp.concatenate([w_hh[0], w_hh[1], w_hh[2]], axis=-1)   # (H, 3H)
    b_g = jnp.concatenate([b_ih[0] + b_hh[0],
                           b_ih[1] + b_hh[1],
                           b_ih[2]], axis=-1)                        # (1, 3H)
    b_hn = b_hh[2]                                                   # (1, H)

    # Wrapper-side flatten: metadata-only on the HBM array; the kernel then
    # computes in the layout it actually sees (no in-kernel relayout copies).
    x_flat = x.reshape(T * B, I)

    vmem = lambda: pl.BlockSpec(memory_space=pltpu.MemorySpace.VMEM)
    slab = pl.pallas_call(
        gru_kernel,
        out_shape=jax.ShapeDtypeStruct((B, T * H), jnp.float32),
        in_specs=[vmem() for _ in range(5)],
        out_specs=vmem(),
    )(x_flat, w_ih_s, w_hh_s, b_g, b_hn)

    # Cheap wrapper-side unpack of the 2 KB slab back to PyTorch layout.
    outputs = slab.reshape(B, T, H).transpose(1, 0, 2)               # (T, B, H)
    h_n = outputs[-1][None]                                          # (1, B, H)
    return outputs, h_n


def gru_reference(x, w_ih, w_hh, b_ih, b_hh):
    """Pure-JAX reference (same math as PyTorch nn.GRU, single layer, h0=0)."""
    T, B, I = x.shape
    H = w_ih.shape[-1]
    h = jnp.zeros((B, H), jnp.float32)
    outs = []
    for t in range(T):
        x_t = x[t]
        r = jax.nn.sigmoid(x_t @ w_ih[0] + b_ih[0] + h @ w_hh[0] + b_hh[0])
        z = jax.nn.sigmoid(x_t @ w_ih[1] + b_ih[1] + h @ w_hh[1] + b_hh[1])
        n = jnp.tanh(x_t @ w_ih[2] + b_ih[2] + r * (h @ w_hh[2] + b_hh[2]))
        h = (1.0 - z) * n + z * h
        outs.append(h)
    return jnp.stack(outs, 0), h[None]


if __name__ == "__main__":
    key = jax.random.PRNGKey(0)
    T, B, I, H = 8, 4, INPUT_SIZE, HIDDEN_SIZE

    k_x, k_wih, k_whh, k_bih, k_bhh = jax.random.split(key, 5)
    scale = 1.0 / np.sqrt(H)  # matches PyTorch uniform(-1/sqrt(H), 1/sqrt(H)) init

    x = jax.random.normal(k_x, (T, B, I), jnp.float32)
    # Stacked per-gate weights (r, z, n), already transposed for x @ W form:
    w_ih = jax.random.uniform(k_wih, (3, I, H), jnp.float32, -scale, scale)
    w_hh = jax.random.uniform(k_whh, (3, H, H), jnp.float32, -scale, scale)
    b_ih = jax.random.uniform(k_bih, (3, 1, H), jnp.float32, -scale, scale)
    b_hh = jax.random.uniform(k_bhh, (3, 1, H), jnp.float32, -scale, scale)

    outputs, h_n = jax.block_until_ready(gru_encoder(x, w_ih, w_hh, b_ih, b_hh))

    # Correctness check against a pure-JAX f32 GRU with identical math.
    # Kernel matmul operands are bf16 (MXU critical-path optimization), so the
    # tolerance is set to a standard mixed-precision bound.
    ref_out, ref_hn = gru_reference(x, w_ih, w_hh, b_ih, b_hh)
    assert outputs.shape == (T, B, H)
    assert h_n.shape == (NUM_LAYERS, B, H)
    np.testing.assert_allclose(np.asarray(outputs), np.asarray(ref_out),
                               rtol=2e-2, atol=2e-2)
    np.testing.assert_allclose(np.asarray(h_n), np.asarray(ref_hn),
                               rtol=2e-2, atol=2e-2)

    print("KERNEL_OK")
</pallas_src>

<mosaic_0001>
module attributes {stable_mosaic.version = 11 : i64} {
  func.func @gru_kernel(%arg0: memref<32x2xf32, #tpu.memory_space<vmem>>, %arg1: memref<2x48xf32, #tpu.memory_space<vmem>>, %arg2: memref<16x48xf32, #tpu.memory_space<vmem>>, %arg3: memref<1x48xf32, #tpu.memory_space<vmem>>, %arg4: memref<1x16xf32, #tpu.memory_space<vmem>>, %arg5: memref<4x128xf32, #tpu.memory_space<vmem>>) attributes {dimension_semantics = [], scalar_prefetch = 0 : i64, scratch_operands = 0 : i64, tpu.core_type = #tpu.core_type<tc>} {
    %c0 = arith.constant 0 : index
    %c0_0 = arith.constant 0 : index
    %0 = vector.load %arg0[%c0, %c0_0] : memref<32x2xf32, #tpu.memory_space<vmem>>, vector<32x2xf32>
    %1 = arith.truncf %0 : vector<32x2xf32> to vector<32x2xbf16>
    %c0_1 = arith.constant 0 : index
    %c0_2 = arith.constant 0 : index
    %2 = vector.load %arg1[%c0_1, %c0_2] : memref<2x48xf32, #tpu.memory_space<vmem>>, vector<2x48xf32>
    %3 = arith.truncf %2 : vector<2x48xf32> to vector<2x48xbf16>
    %cst = arith.constant dense<0.000000e+00> : vector<32x48xf32>
    %4 = tpu.matmul %1, %3, %cst {dimension_numbers = #tpu.dot_dimension_numbers<[1], [0], [0], [1], [0, 0, 1, 1], [], []>} : vector<32x2xbf16>, vector<2x48xbf16>, vector<32x48xf32> -> vector<32x48xf32>
    %c0_3 = arith.constant 0 : index
    %c0_4 = arith.constant 0 : index
    %5 = vector.load %arg3[%c0_3, %c0_4] : memref<1x48xf32, #tpu.memory_space<vmem>>, vector<1x48xf32>
    %6 = vector.broadcast %5 : vector<1x48xf32> to vector<32x48xf32>
    %7 = arith.addf %4, %6 : vector<32x48xf32>
    %c0_5 = arith.constant 0 : index
    %c0_6 = arith.constant 0 : index
    %8 = vector.load %arg2[%c0_5, %c0_6] : memref<16x48xf32, #tpu.memory_space<vmem>>, vector<16x48xf32>
    %9 = arith.truncf %8 : vector<16x48xf32> to vector<16x48xbf16>
    %c0_7 = arith.constant 0 : index
    %c0_8 = arith.constant 0 : index
    %10 = vector.load %arg4[%c0_7, %c0_8] : memref<1x16xf32, #tpu.memory_space<vmem>>, vector<1x16xf32>
    %11 = vector.shape_cast %10 : vector<1x16xf32> to vector<1x16xf32>
    %12 = vector.broadcast %11 : vector<1x16xf32> to vector<4x16xf32>
    %cst_9 = arith.constant 0.000000e+00 : f32
    %13 = vector.broadcast %cst_9 : f32 to vector<4x16xf32>
    %14 = arith.truncf %13 : vector<4x16xf32> to vector<4x16xbf16>
    %cst_10 = arith.constant dense<0.000000e+00> : vector<4x48xf32>
    %15 = tpu.matmul %14, %9, %cst_10 {dimension_numbers = #tpu.dot_dimension_numbers<[1], [0], [0], [1], [0, 0, 1, 1], [], []>} : vector<4x16xbf16>, vector<16x48xbf16>, vector<4x48xf32> -> vector<4x48xf32>
    %16 = vector.extract_strided_slice %7 {offsets = [0, 0], sizes = [4, 48], strides = [1, 1]} : vector<32x48xf32> to vector<4x48xf32>
    %17 = vector.extract_strided_slice %16 {offsets = [0, 0], sizes = [4, 16], strides = [1, 1]} : vector<4x48xf32> to vector<4x16xf32>
    %18 = vector.extract_strided_slice %15 {offsets = [0, 0], sizes = [4, 16], strides = [1, 1]} : vector<4x48xf32> to vector<4x16xf32>
    %19 = arith.addf %17, %18 : vector<4x16xf32>
    %20 = arith.negf %19 : vector<4x16xf32>
    %21 = math.exp %20 : vector<4x16xf32>
    %cst_11 = arith.constant 1.000000e+00 : f32
    %22 = vector.broadcast %cst_11 : f32 to vector<4x16xf32>
    %23 = arith.addf %22, %21 : vector<4x16xf32>
    %24 = arith.divf %22, %23 : vector<4x16xf32>
    %25 = vector.extract_strided_slice %16 {offsets = [0, 16], sizes = [4, 16], strides = [1, 1]} : vector<4x48xf32> to vector<4x16xf32>
    %26 = vector.extract_strided_slice %15 {offsets = [0, 16], sizes = [4, 16], strides = [1, 1]} : vector<4x48xf32> to vector<4x16xf32>
    %27 = arith.addf %25, %26 : vector<4x16xf32>
    %28 = arith.negf %27 : vector<4x16xf32>
    %29 = math.exp %28 : vector<4x16xf32>
    %cst_12 = arith.constant 1.000000e+00 : f32
    %30 = vector.broadcast %cst_12 : f32 to vector<4x16xf32>
    %31 = arith.addf %30, %29 : vector<4x16xf32>
    %32 = arith.divf %30, %31 : vector<4x16xf32>
    %33 = vector.extract_strided_slice %16 {offsets = [0, 32], sizes = [4, 16], strides = [1, 1]} : vector<4x48xf32> to vector<4x16xf32>
    %34 = vector.extract_strided_slice %15 {offsets = [0, 32], sizes = [4, 16], strides = [1, 1]} : vector<4x48xf32> to vector<4x16xf32>
    %35 = arith.addf %34, %12 : vector<4x16xf32>
    %36 = arith.mulf %24, %35 : vector<4x16xf32>
    %37 = arith.addf %33, %36 : vector<4x16xf32>
    %38 = math.tanh %37 : vector<4x16xf32>
    %cst_13 = arith.constant 1.000000e+00 : f32
    %39 = vector.broadcast %cst_13 : f32 to vector<4x16xf32>
    %40 = arith.subf %39, %32 : vector<4x16xf32>
    %41 = arith.mulf %40, %38 : vector<4x16xf32>
    %42 = arith.mulf %32, %13 : vector<4x16xf32>
    %43 = arith.addf %41, %42 : vector<4x16xf32>
    %44 = arith.truncf %43 : vector<4x16xf32> to vector<4x16xbf16>
    %cst_14 = arith.constant dense<0.000000e+00> : vector<4x48xf32>
    %45 = tpu.matmul %44, %9, %cst_14 {dimension_numbers = #tpu.dot_dimension_numbers<[1], [0], [0], [1], [0, 0, 1, 1], [], []>} : vector<4x16xbf16>, vector<16x48xbf16>, vector<4x48xf32> -> vector<4x48xf32>
    %46 = vector.extract_strided_slice %7 {offsets = [4, 0], sizes = [4, 48], strides = [1, 1]} : vector<32x48xf32> to vector<4x48xf32>
    %47 = vector.extract_strided_slice %46 {offsets = [0, 0], sizes = [4, 16], strides = [1, 1]} : vector<4x48xf32> to vector<4x16xf32>
    %48 = vector.extract_strided_slice %45 {offsets = [0, 0], sizes = [4, 16], strides = [1, 1]} : vector<4x48xf32> to vector<4x16xf32>
    %49 = arith.addf %47, %48 : vector<4x16xf32>
    %50 = arith.negf %49 : vector<4x16xf32>
    %51 = math.exp %50 : vector<4x16xf32>
    %cst_15 = arith.constant 1.000000e+00 : f32
    %52 = vector.broadcast %cst_15 : f32 to vector<4x16xf32>
    %53 = arith.addf %52, %51 : vector<4x16xf32>
    %54 = arith.divf %52, %53 : vector<4x16xf32>
    %55 = vector.extract_strided_slice %46 {offsets = [0, 16], sizes = [4, 16], strides = [1, 1]} : vector<4x48xf32> to vector<4x16xf32>
    %56 = vector.extract_strided_slice %45 {offsets = [0, 16], sizes = [4, 16], strides = [1, 1]} : vector<4x48xf32> to vector<4x16xf32>
    %57 = arith.addf %55, %56 : vector<4x16xf32>
    %58 = arith.negf %57 : vector<4x16xf32>
    %59 = math.exp %58 : vector<4x16xf32>
    %cst_16 = arith.constant 1.000000e+00 : f32
    %60 = vector.broadcast %cst_16 : f32 to vector<4x16xf32>
    %61 = arith.addf %60, %59 : vector<4x16xf32>
    %62 = arith.divf %60, %61 : vector<4x16xf32>
    %63 = vector.extract_strided_slice %46 {offsets = [0, 32], sizes = [4, 16], strides = [1, 1]} : vector<4x48xf32> to vector<4x16xf32>
    %64 = vector.extract_strided_slice %45 {offsets = [0, 32], sizes = [4, 16], strides = [1, 1]} : vector<4x48xf32> to vector<4x16xf32>
    %65 = arith.addf %64, %12 : vector<4x16xf32>
    %66 = arith.mulf %54, %65 : vector<4x16xf32>
    %67 = arith.addf %63, %66 : vector<4x16xf32>
    %68 = math.tanh %67 : vector<4x16xf32>
    %cst_17 = arith.constant 1.000000e+00 : f32
    %69 = vector.broadcast %cst_17 : f32 to vector<4x16xf32>
    %70 = arith.subf %69, %62 : vector<4x16xf32>
    %71 = arith.mulf %70, %68 : vector<4x16xf32>
    %72 = arith.mulf %62, %43 : vector<4x16xf32>
    %73 = arith.addf %71, %72 : vector<4x16xf32>
    %74 = arith.truncf %73 : vector<4x16xf32> to vector<4x16xbf16>
    %cst_18 = arith.constant dense<0.000000e+00> : vector<4x48xf32>
    %75 = tpu.matmul %74, %9, %cst_18 {dimension_numbers = #tpu.dot_dimension_numbers<[1], [0], [0], [1], [0, 0, 1, 1], [], []>} : vector<4x16xbf16>, vector<16x48xbf16>, vector<4x48xf32> -> vector<4x48xf32>
    %76 = vector.extract_strided_slice %7 {offsets = [8, 0], sizes = [4, 48], strides = [1, 1]} : vector<32x48xf32> to vector<4x48xf32>
    %77 = vector.extract_strided_slice %76 {offsets = [0, 0], sizes = [4, 16], strides = [1, 1]} : vector<4x48xf32> to vector<4x16xf32>
    %78 = vector.extract_strided_slice %75 {offsets = [0, 0], sizes = [4, 16], strides = [1, 1]} : vector<4x48xf32> to vector<4x16xf32>
    %79 = arith.addf %77, %78 : vector<4x16xf32>
    %80 = arith.negf %79 : vector<4x16xf32>
    %81 = math.exp %80 : vector<4x16xf32>
    %cst_19 = arith.constant 1.000000e+00 : f32
    %82 = vector.broadcast %cst_19 : f32 to vector<4x16xf32>
    %83 = arith.addf %82, %81 : vector<4x16xf32>
    %84 = arith.divf %82, %83 : vector<4x16xf32>
    %85 = vector.extract_strided_slice %76 {offsets = [0, 16], sizes = [4, 16], strides = [1, 1]} : vector<4x48xf32> to vector<4x16xf32>
    %86 = vector.extract_strided_slice %75 {offsets = [0, 16], sizes = [4, 16], strides = [1, 1]} : vector<4x48xf32> to vector<4x16xf32>
    %87 = arith.addf %85, %86 : vector<4x16xf32>
    %88 = arith.negf %87 : vector<4x16xf32>
    %89 = math.exp %88 : vector<4x16xf32>
    %cst_20 = arith.constant 1.000000e+00 : f32
    %90 = vector.broadcast %cst_20 : f32 to vector<4x16xf32>
    %91 = arith.addf %90, %89 : vector<4x16xf32>
    %92 = arith.divf %90, %91 : vector<4x16xf32>
    %93 = vector.extract_strided_slice %76 {offsets = [0, 32], sizes = [4, 16], strides = [1, 1]} : vector<4x48xf32> to vector<4x16xf32>
    %94 = vector.extract_strided_slice %75 {offsets = [0, 32], sizes = [4, 16], strides = [1, 1]} : vector<4x48xf32> to vector<4x16xf32>
    %95 = arith.addf %94, %12 : vector<4x16xf32>
    %96 = arith.mulf %84, %95 : vector<4x16xf32>
    %97 = arith.addf %93, %96 : vector<4x16xf32>
    %98 = math.tanh %97 : vector<4x16xf32>
    %cst_21 = arith.constant 1.000000e+00 : f32
    %99 = vector.broadcast %cst_21 : f32 to vector<4x16xf32>
    %100 = arith.subf %99, %92 : vector<4x16xf32>
    %101 = arith.mulf %100, %98 : vector<4x16xf32>
    %102 = arith.mulf %92, %73 : vector<4x16xf32>
    %103 = arith.addf %101, %102 : vector<4x16xf32>
    %104 = arith.truncf %103 : vector<4x16xf32> to vector<4x16xbf16>
    %cst_22 = arith.constant dense<0.000000e+00> : vector<4x48xf32>
    %105 = tpu.matmul %104, %9, %cst_22 {dimension_numbers = #tpu.dot_dimension_numbers<[1], [0], [0], [1], [0, 0, 1, 1], [], []>} : vector<4x16xbf16>, vector<16x48xbf16>, vector<4x48xf32> -> vector<4x48xf32>
    %106 = vector.extract_strided_slice %7 {offsets = [12, 0], sizes = [4, 48], strides = [1, 1]} : vector<32x48xf32> to vector<4x48xf32>
    %107 = vector.extract_strided_slice %106 {offsets = [0, 0], sizes = [4, 16], strides = [1, 1]} : vector<4x48xf32> to vector<4x16xf32>
    %108 = vector.extract_strided_slice %105 {offsets = [0, 0], sizes = [4, 16], strides = [1, 1]} : vector<4x48xf32> to vector<4x16xf32>
    %109 = arith.addf %107, %108 : vector<4x16xf32>
    %110 = arith.negf %109 : vector<4x16xf32>
    %111 = math.exp %110 : vector<4x16xf32>
    %cst_23 = arith.constant 1.000000e+00 : f32
    %112 = vector.broadcast %cst_23 : f32 to vector<4x16xf32>
    %113 = arith.addf %112, %111 : vector<4x16xf32>
    %114 = arith.divf %112, %113 : vector<4x16xf32>
    %115 = vector.extract_strided_slice %106 {offsets = [0, 16], sizes = [4, 16], strides = [1, 1]} : vector<4x48xf32> to vector<4x16xf32>
    %116 = vector.extract_strided_slice %105 {offsets = [0, 16], sizes = [4, 16], strides = [1, 1]} : vector<4x48xf32> to vector<4x16xf32>
    %117 = arith.addf %115, %116 : vector<4x16xf32>
    %118 = arith.negf %117 : vector<4x16xf32>
    %119 = math.exp %118 : vector<4x16xf32>
    %cst_24 = arith.constant 1.000000e+00 : f32
    %120 = vector.broadcast %cst_24 : f32 to vector<4x16xf32>
    %121 = arith.addf %120, %119 : vector<4x16xf32>
    %122 = arith.divf %120, %121 : vector<4x16xf32>
    %123 = vector.extract_strided_slice %106 {offsets = [0, 32], sizes = [4, 16], strides = [1, 1]} : vector<4x48xf32> to vector<4x16xf32>
    %124 = vector.extract_strided_slice %105 {offsets = [0, 32], sizes = [4, 16], strides = [1, 1]} : vector<4x48xf32> to vector<4x16xf32>
    %125 = arith.addf %124, %12 : vector<4x16xf32>
    %126 = arith.mulf %114, %125 : vector<4x16xf32>
    %127 = arith.addf %123, %126 : vector<4x16xf32>
    %128 = math.tanh %127 : vector<4x16xf32>
    %cst_25 = arith.constant 1.000000e+00 : f32
    %129 = vector.broadcast %cst_25 : f32 to vector<4x16xf32>
    %130 = arith.subf %129, %122 : vector<4x16xf32>
    %131 = arith.mulf %130, %128 : vector<4x16xf32>
    %132 = arith.mulf %122, %103 : vector<4x16xf32>
    %133 = arith.addf %131, %132 : vector<4x16xf32>
    %134 = arith.truncf %133 : vector<4x16xf32> to vector<4x16xbf16>
    %cst_26 = arith.constant dense<0.000000e+00> : vector<4x48xf32>
    %135 = tpu.matmul %134, %9, %cst_26 {dimension_numbers = #tpu.dot_dimension_numbers<[1], [0], [0], [1], [0, 0, 1, 1], [], []>} : vector<4x16xbf16>, vector<16x48xbf16>, vector<4x48xf32> -> vector<4x48xf32>
    %136 = vector.extract_strided_slice %7 {offsets = [16, 0], sizes = [4, 48], strides = [1, 1]} : vector<32x48xf32> to vector<4x48xf32>
    %137 = vector.extract_strided_slice %136 {offsets = [0, 0], sizes = [4, 16], strides = [1, 1]} : vector<4x48xf32> to vector<4x16xf32>
    %138 = vector.extract_strided_slice %135 {offsets = [0, 0], sizes = [4, 16], strides = [1, 1]} : vector<4x48xf32> to vector<4x16xf32>
    %139 = arith.addf %137, %138 : vector<4x16xf32>
    %140 = arith.negf %139 : vector<4x16xf32>
    %141 = math.exp %140 : vector<4x16xf32>
    %cst_27 = arith.constant 1.000000e+00 : f32
    %142 = vector.broadcast %cst_27 : f32 to vector<4x16xf32>
    %143 = arith.addf %142, %141 : vector<4x16xf32>
    %144 = arith.divf %142, %143 : vector<4x16xf32>
    %145 = vector.extract_strided_slice %136 {offsets = [0, 16], sizes = [4, 16], strides = [1, 1]} : vector<4x48xf32> to vector<4x16xf32>
    %146 = vector.extract_strided_slice %135 {offsets = [0, 16], sizes = [4, 16], strides = [1, 1]} : vector<4x48xf32> to vector<4x16xf32>
    %147 = arith.addf %145, %146 : vector<4x16xf32>
    %148 = arith.negf %147 : vector<4x16xf32>
    %149 = math.exp %148 : vector<4x16xf32>
    %cst_28 = arith.constant 1.000000e+00 : f32
    %150 = vector.broadcast %cst_28 : f32 to vector<4x16xf32>
    %151 = arith.addf %150, %149 : vector<4x16xf32>
    %152 = arith.divf %150, %151 : vector<4x16xf32>
    %153 = vector.extract_strided_slice %136 {offsets = [0, 32], sizes = [4, 16], strides = [1, 1]} : vector<4x48xf32> to vector<4x16xf32>
    %154 = vector.extract_strided_slice %135 {offsets = [0, 32], sizes = [4, 16], strides = [1, 1]} : vector<4x48xf32> to vector<4x16xf32>
    %155 = arith.addf %154, %12 : vector<4x16xf32>
    %156 = arith.mulf %144, %155 : vector<4x16xf32>
    %157 = arith.addf %153, %156 : vector<4x16xf32>
    %158 = math.tanh %157 : vector<4x16xf32>
    %cst_29 = arith.constant 1.000000e+00 : f32
    %159 = vector.broadcast %cst_29 : f32 to vector<4x16xf32>
    %160 = arith.subf %159, %152 : vector<4x16xf32>
    %161 = arith.mulf %160, %158 : vector<4x16xf32>
    %162 = arith.mulf %152, %133 : vector<4x16xf32>
    %163 = arith.addf %161, %162 : vector<4x16xf32>
    %164 = arith.truncf %163 : vector<4x16xf32> to vector<4x16xbf16>
    %cst_30 = arith.constant dense<0.000000e+00> : vector<4x48xf32>
    %165 = tpu.matmul %164, %9, %cst_30 {dimension_numbers = #tpu.dot_dimension_numbers<[1], [0], [0], [1], [0, 0, 1, 1], [], []>} : vector<4x16xbf16>, vector<16x48xbf16>, vector<4x48xf32> -> vector<4x48xf32>
    %166 = vector.extract_strided_slice %7 {offsets = [20, 0], sizes = [4, 48], strides = [1, 1]} : vector<32x48xf32> to vector<4x48xf32>
    %167 = vector.extract_strided_slice %166 {offsets = [0, 0], sizes = [4, 16], strides = [1, 1]} : vector<4x48xf32> to vector<4x16xf32>
    %168 = vector.extract_strided_slice %165 {offsets = [0, 0], sizes = [4, 16], strides = [1, 1]} : vector<4x48xf32> to vector<4x16xf32>
    %169 = arith.addf %167, %168 : vector<4x16xf32>
    %170 = arith.negf %169 : vector<4x16xf32>
    %171 = math.exp %170 : vector<4x16xf32>
    %cst_31 = arith.constant 1.000000e+00 : f32
    %172 = vector.broadcast %cst_31 : f32 to vector<4x16xf32>
    %173 = arith.addf %172, %171 : vector<4x16xf32>
    %174 = arith.divf %172, %173 : vector<4x16xf32>
    %175 = vector.extract_strided_slice %166 {offsets = [0, 16], sizes = [4, 16], strides = [1, 1]} : vector<4x48xf32> to vector<4x16xf32>
    %176 = vector.extract_strided_slice %165 {offsets = [0, 16], sizes = [4, 16], strides = [1, 1]} : vector<4x48xf32> to vector<4x16xf32>
    %177 = arith.addf %175, %176 : vector<4x16xf32>
    %178 = arith.negf %177 : vector<4x16xf32>
    %179 = math.exp %178 : vector<4x16xf32>
    %cst_32 = arith.constant 1.000000e+00 : f32
    %180 = vector.broadcast %cst_32 : f32 to vector<4x16xf32>
    %181 = arith.addf %180, %179 : vector<4x16xf32>
    %182 = arith.divf %180, %181 : vector<4x16xf32>
    %183 = vector.extract_strided_slice %166 {offsets = [0, 32], sizes = [4, 16], strides = [1, 1]} : vector<4x48xf32> to vector<4x16xf32>
    %184 = vector.extract_strided_slice %165 {offsets = [0, 32], sizes = [4, 16], strides = [1, 1]} : vector<4x48xf32> to vector<4x16xf32>
    %185 = arith.addf %184, %12 : vector<4x16xf32>
    %186 = arith.mulf %174, %185 : vector<4x16xf32>
    %187 = arith.addf %183, %186 : vector<4x16xf32>
    %188 = math.tanh %187 : vector<4x16xf32>
    %cst_33 = arith.constant 1.000000e+00 : f32
    %189 = vector.broadcast %cst_33 : f32 to vector<4x16xf32>
    %190 = arith.subf %189, %182 : vector<4x16xf32>
    %191 = arith.mulf %190, %188 : vector<4x16xf32>
    %192 = arith.mulf %182, %163 : vector<4x16xf32>
    %193 = arith.addf %191, %192 : vector<4x16xf32>
    %194 = arith.truncf %193 : vector<4x16xf32> to vector<4x16xbf16>
    %cst_34 = arith.constant dense<0.000000e+00> : vector<4x48xf32>
    %195 = tpu.matmul %194, %9, %cst_34 {dimension_numbers = #tpu.dot_dimension_numbers<[1], [0], [0], [1], [0, 0, 1, 1], [], []>} : vector<4x16xbf16>, vector<16x48xbf16>, vector<4x48xf32> -> vector<4x48xf32>
    %196 = vector.extract_strided_slice %7 {offsets = [24, 0], sizes = [4, 48], strides = [1, 1]} : vector<32x48xf32> to vector<4x48xf32>
    %197 = vector.extract_strided_slice %196 {offsets = [0, 0], sizes = [4, 16], strides = [1, 1]} : vector<4x48xf32> to vector<4x16xf32>
    %198 = vector.extract_strided_slice %195 {offsets = [0, 0], sizes = [4, 16], strides = [1, 1]} : vector<4x48xf32> to vector<4x16xf32>
    %199 = arith.addf %197, %198 : vector<4x16xf32>
    %200 = arith.negf %199 : vector<4x16xf32>
    %201 = math.exp %200 : vector<4x16xf32>
    %cst_35 = arith.constant 1.000000e+00 : f32
    %202 = vector.broadcast %cst_35 : f32 to vector<4x16xf32>
    %203 = arith.addf %202, %201 : vector<4x16xf32>
    %204 = arith.divf %202, %203 : vector<4x16xf32>
    %205 = vector.extract_strided_slice %196 {offsets = [0, 16], sizes = [4, 16], strides = [1, 1]} : vector<4x48xf32> to vector<4x16xf32>
    %206 = vector.extract_strided_slice %195 {offsets = [0, 16], sizes = [4, 16], strides = [1, 1]} : vector<4x48xf32> to vector<4x16xf32>
    %207 = arith.addf %205, %206 : vector<4x16xf32>
    %208 = arith.negf %207 : vector<4x16xf32>
    %209 = math.exp %208 : vector<4x16xf32>
    %cst_36 = arith.constant 1.000000e+00 : f32
    %210 = vector.broadcast %cst_36 : f32 to vector<4x16xf32>
    %211 = arith.addf %210, %209 : vector<4x16xf32>
    %212 = arith.divf %210, %211 : vector<4x16xf32>
    %213 = vector.extract_strided_slice %196 {offsets = [0, 32], sizes = [4, 16], strides = [1, 1]} : vector<4x48xf32> to vector<4x16xf32>
    %214 = vector.extract_strided_slice %195 {offsets = [0, 32], sizes = [4, 16], strides = [1, 1]} : vector<4x48xf32> to vector<4x16xf32>
    %215 = arith.addf %214, %12 : vector<4x16xf32>
    %216 = arith.mulf %204, %215 : vector<4x16xf32>
    %217 = arith.addf %213, %216 : vector<4x16xf32>
    %218 = math.tanh %217 : vector<4x16xf32>
    %cst_37 = arith.constant 1.000000e+00 : f32
    %219 = vector.broadcast %cst_37 : f32 to vector<4x16xf32>
    %220 = arith.subf %219, %212 : vector<4x16xf32>
    %221 = arith.mulf %220, %218 : vector<4x16xf32>
    %222 = arith.mulf %212, %193 : vector<4x16xf32>
    %223 = arith.addf %221, %222 : vector<4x16xf32>
    %224 = arith.truncf %223 : vector<4x16xf32> to vector<4x16xbf16>
    %cst_38 = arith.constant dense<0.000000e+00> : vector<4x48xf32>
    %225 = tpu.matmul %224, %9, %cst_38 {dimension_numbers = #tpu.dot_dimension_numbers<[1], [0], [0], [1], [0, 0, 1, 1], [], []>} : vector<4x16xbf16>, vector<16x48xbf16>, vector<4x48xf32> -> vector<4x48xf32>
    %226 = vector.extract_strided_slice %7 {offsets = [28, 0], sizes = [4, 48], strides = [1, 1]} : vector<32x48xf32> to vector<4x48xf32>
    %227 = vector.extract_strided_slice %226 {offsets = [0, 0], sizes = [4, 16], strides = [1, 1]} : vector<4x48xf32> to vector<4x16xf32>
    %228 = vector.extract_strided_slice %225 {offsets = [0, 0], sizes = [4, 16], strides = [1, 1]} : vector<4x48xf32> to vector<4x16xf32>
    %229 = arith.addf %227, %228 : vector<4x16xf32>
    %230 = arith.negf %229 : vector<4x16xf32>
    %231 = math.exp %230 : vector<4x16xf32>
    %cst_39 = arith.constant 1.000000e+00 : f32
    %232 = vector.broadcast %cst_39 : f32 to vector<4x16xf32>
    %233 = arith.addf %232, %231 : vector<4x16xf32>
    %234 = arith.divf %232, %233 : vector<4x16xf32>
    %235 = vector.extract_strided_slice %226 {offsets = [0, 16], sizes = [4, 16], strides = [1, 1]} : vector<4x48xf32> to vector<4x16xf32>
    %236 = vector.extract_strided_slice %225 {offsets = [0, 16], sizes = [4, 16], strides = [1, 1]} : vector<4x48xf32> to vector<4x16xf32>
    %237 = arith.addf %235, %236 : vector<4x16xf32>
    %238 = arith.negf %237 : vector<4x16xf32>
    %239 = math.exp %238 : vector<4x16xf32>
    %cst_40 = arith.constant 1.000000e+00 : f32
    %240 = vector.broadcast %cst_40 : f32 to vector<4x16xf32>
    %241 = arith.addf %240, %239 : vector<4x16xf32>
    %242 = arith.divf %240, %241 : vector<4x16xf32>
    %243 = vector.extract_strided_slice %226 {offsets = [0, 32], sizes = [4, 16], strides = [1, 1]} : vector<4x48xf32> to vector<4x16xf32>
    %244 = vector.extract_strided_slice %225 {offsets = [0, 32], sizes = [4, 16], strides = [1, 1]} : vector<4x48xf32> to vector<4x16xf32>
    %245 = arith.addf %244, %12 : vector<4x16xf32>
    %246 = arith.mulf %234, %245 : vector<4x16xf32>
    %247 = arith.addf %243, %246 : vector<4x16xf32>
    %248 = math.tanh %247 : vector<4x16xf32>
    %cst_41 = arith.constant 1.000000e+00 : f32
    %249 = vector.broadcast %cst_41 : f32 to vector<4x16xf32>
    %250 = arith.subf %249, %242 : vector<4x16xf32>
    %251 = arith.mulf %250, %248 : vector<4x16xf32>
    %252 = arith.mulf %242, %223 : vector<4x16xf32>
    %253 = arith.addf %251, %252 : vector<4x16xf32>
    %254 = tpu.concatenate %43, %73, %103, %133, %163, %193, %223, %253 in 1 : vector<4x16xf32>, vector<4x16xf32>, vector<4x16xf32>, vector<4x16xf32>, vector<4x16xf32>, vector<4x16xf32>, vector<4x16xf32>, vector<4x16xf32> -> vector<4x128xf32>
    %c0_42 = arith.constant 0 : index
    %c0_43 = arith.constant 0 : index
    %255 = vector.load %arg5[%c0_42, %c0_43] : memref<4x128xf32, #tpu.memory_space<vmem>>, vector<4x128xf32>
    tpu.vector_store %arg5[%c0_42, %c0_43], %254 {strides = array<i32>} : memref<4x128xf32, #tpu.memory_space<vmem>>, vector<4x128xf32>,
    return
  }
}

</mosaic_0001>

<bundles_post_ra>
// kernel: tpu_custom_call.1
= control target key start
LH: loop header
LB: loop body
LE: loop exit
PB: predicated region body
PF: predicated region fallthrough
CT: control target
= control target key end

     0   :  { %vm44_vm0 = vcmask 1040384   ;;  %v965_v3 = vmov 0.0   ;;  %vm37_vm1 = vcmask 15360   ;;  %vm966_vm2 = vmmov 0   ;;  %s1190_s0 = inlined_call_operand.vmem [shape: f32[32,2], index: 0, kind: input, shape index: {}]   ;;  %s1191_s1 = inlined_call_operand.vmem [shape: f32[2,48], index: 1, kind: input, shape index: {}]   ;;  %s1192_s2 = inlined_call_operand.vmem [shape: f32[16,48], index: 2, kind: input, shape index: {}]   ;;  %s1193_s3 = inlined_call_operand.vmem [shape: f32[1,48], index: 3, kind: input, shape index: {}]   ;;  %s1194_s4 = inlined_call_operand.vmem [shape: f32[1,16], index: 4, kind: input, shape index: {}]   ;;  %s1195_s5 = inlined_call_operand.hbm [shape: f32[4,128], index: 5, kind: output, shape index: {}]  }
   0x1   :  { %v28_v0 = vld [vmem:[%s1191_s1] sm:$0x3]  ;;  %v98_v2 = vld [vmem:[%s1192_s2 + $0x8] sm:$0xff]  ;;  %833 = vmatprep.subr.bf16.mxu1 %v965_v3  ;;  %v24_v8 = vld [vmem:[%s1190_s0 + $0x10] sm:$0xff]  ;;  %835 = vmatprep.mubr.msk.bf16.mxu1 %vm966_vm2, %v965_v3 }
   0x2   :  { %v97_v1 = vld [vmem:[%s1192_s2] sm:$0xff]  ;;  %v29_v4 = vpack.c.bf16 %v28_v0, %v28_v0  ;;  %v23_v7 = vld [vmem:[%s1190_s0 + $0x8] sm:$0xff]  ;;  %v25_v10 = vld [vmem:[%s1190_s0 + $0x18] sm:$0xff] }
   0x3   :  { %v1016_v5 = vpack.c.bf16 %v98_v2, %v97_v1  ;;  %v22_v6 = vld [vmem:[%s1190_s0] sm:$0xff] }
   0x4   :  { %v26_v9 = vpack.c.bf16 %v23_v7, %v22_v6  ;;  %v792_v11 = vld [vmem:[%s1194_s4] ss:$0 sm:$0xff] }
   0x5   :  { %10 = vsyncpa [#allocation3], 0  ;;  %881 = vmatprep.subr.msk.bf16.mxu0 %vm44_vm0, %v29_v4  ;;  %834 = vmatpush3.bf16.msra.mxu1 %v1016_v5  ;;  %v46_v12 = vsel %vm44_vm0, %v29_v4, 0  ;;  %v27_v13 = vpack.c.bf16 %v25_v10, %v24_v8  ;;  %s967_s7 = smov 32   ;;  %v968_v14 = vmov 0   ;;  %s969_s8 = smov 96  }
   0x6   :  { %828 = vmatpush3.bf16.msra.mxu0 %v46_v12  ;;  %829 = vmatprep.mubr.msk.bf16.mxu0 %vm37_vm1, %v26_v9  ;;  %v789_v19 = vld [vmem:[%s1193_s3] ss:$0 sm:$0xff]  ;;  %s970_s3 = smov 112   ;;  %vm106_vm3 = vcmask 130048   ;;  %s971_s9 = smov 64   ;;  %vm762_vm4 = vcmask 261120  }
   0x7   :  { %157 = vrot.lane.b32.xlu0 %v792_v11, %s967_s7  ;;  %839 = vmatprep.subr.bf16.mxu0 %v965_v3  ;;  %s972_s10 = smov 16   ;;  %s973_s11 = smov 48   ;;  %vm764_vm5 = vcmask 392192   ;;  %vm766_vm6 = vcmask 523264   ;;  %vm768_vm7 = vcmask 654336   ;;  %vm770_vm8 = vcmask 785408  }
   0x8   :  { %836 = vmatmul.mubr.bf16.vlgmr.msra.gmra.mrb[0].mxu1 %v968_v14  ;;  %845 = vmatprep.subr.bf16.mxu1 %v965_v3  ;;  %s974_s12 = smov 80   ;;  %s975_s13 = smov [#allocation2]   ;;  %vm772_vm9 = vcmask 916480  }
   0x9   :  { %830 = vmatmul.mubr.msk.bf16.vlgmr.msra.gmra.mrb[0].mxu0 %vm37_vm1, %v27_v13  ;;  %846 = vmatpush3.bf16.msra.mxu1 %v1016_v5  ;;  %s781_s14 = sshll.u32 %s975_s13, 4  ;;  %s782_s14 = int_to_ptr.vmem [resolvable:$true] %s781_s14 }
   0xa   :  { %840 = vmatpush3.bf16.msra.mxu0 %v1016_v5  ;;  %841 = vmatprep.mubr.msk.bf16.mxu0 %vm966_vm2, %v965_v3  ;;  %s941_s15 = scalar_lea.vmem %s782_s14, 64  ;;  %p946_p1 = scmp.lt.s32.totalorder %s782_s14, %s782_s14 }
   0xb   :  { %847 = vmatprep.mubr.msk.bf16.mxu1 %vm966_vm2, %v965_v3  ;;  %851 = vmatprep.subr.bf16.mxu0 %v965_v3  ;;  %p942_p0 = scmp.ne.s32.totalorder %s782_s14, %s941_s15  ;;  %p947_p2 = scmp.lt.s32.totalorder %s941_s15, %s941_s15 }
   0xc   :  { %857 = vmatprep.subr.bf16.mxu1 %v965_v3 }
   0xd   :  { %p948_p3 = por %p947_p2, %p946_p1 }
   0xf   :  { %p949_p4 = pnand %p948_p3, %p942_p0 }
  0x79   :  { %v1051_v15 = vpop.permute.xlu0 %157 }
  0xdb   :  { %v144_v16 = vpop.f32.mrb[0].mxu1 }
  0xdc   :  { %v160_v17 = vadd.f32 %v1051_v15, %v144_v16  ;;  %v831_v18 = vpop.f32.mrb[0].mxu0  ;;  %v837_v20 = vpop.f32.mrb[1].mxu1 }
  0xdd   :  { %v1057_v21 = vadd.f32 %v831_v18, %v789_v19  ;;  %v82_v22 = vpop.f32.mrb[1].mxu0  ;;  %v147_v23 = vpop.f32.mrb[2].mxu1 }
  0xde   :  { %162 = vrot.lane.b32.xlu0 %v160_v17, %s969_s8  ;;  %v838_v24 = vpop.f32.mrb[3].mxu1  ;;  %v832_v25 = vpop.f32.mrb[2].mxu0  ;;  %v83_v29 = vadd.f32 %v789_v19, %v82_v22 }
  0xdf   :  { %v1060_v26 = vadd.f32 %v832_v25, %v789_v19  ;;  %v85_v27 = vpop.f32.mrb[3].mxu0 }
  0xe0   :  { %v1062_v28 = vadd.f32 %v789_v19, %v85_v27  ;;  %v150_v30 = vadd.f32 %v144_v16, %v83_v29 }
  0xe2   :  { %v793_v31 = vmul.f32 -1.442695, %v150_v30 }
  0xe4   :  { %893 = vpow2.f32 %v793_v31 }
  0xee   :  { %v894_v32 = vpop.eup %893 }
  0xef   :  { %v154_v33 = vadd.f32 1.0, %v894_v32 }
  0xf1   :  { %895 = vrcp.f32 %v154_v33 }
  0xfb   :  { %v896_v34 = vpop.eup %895 }
  0xfc   :  { %v172_v40 = vsub.f32 1.0, %v896_v34  ;;  %v178_v42 = vmul.f32 0.0, %v896_v34 }
 0x150   :  { %v163_v35 = vpop.permute.xlu0 %162 }
 0x151   :  { %v165_v36 = vmul.f32 %v896_v34, %v163_v35 }
 0x153   :  { %167 = vrot.lane.b32.xlu1 %v165_v36, %s967_s7 }
 0x1c5   :  { %v168_v37 = vpop.permute.xlu1 %167 }
 0x1c6   :  { %v170_v38 = vadd.f32 %v168_v37, %v83_v29 }
 0x1c8   :  { %897 = vtanh.f32 %v170_v38 }
 0x1d2   :  { %v898_v39 = vpop.eup %897 }
 0x1d3   :  { %174 = vrot.lane.b32.xlu1 %v898_v39, %s970_s3 }
 0x245   :  { %v175_v41 = vpop.permute.xlu1 %174 }
 0x246   :  { %v177_v43 = vmul.f32 %v175_v41, %v172_v40 }
 0x248   :  { %v1066_v44 = vadd.f32 %v178_v42, %v177_v43 }
 0x24a   :  { %v180_v45 = vpack.c.bf16 %v1066_v44, %v1066_v44  ;;  %v257_v1 = vrot.slane %v1066_v44, 4 }
 0x24c   :  { %182 = vrot.lane.b32.xlu0 %v180_v45, %s970_s3 }
 0x2be   :  { %v183_v46 = vpop.permute.xlu0 %182 }
 0x2bf   :  { %842 = vmatmul.mubr.msk.bf16.vlgmr.msra.gmra.mrb[4].mxu0 %vm106_vm3, %v183_v46 }
 0x2c0   :  { %852 = vmatpush3.bf16.msra.mxu0 %v1016_v5  ;;  %853 = vmatprep.mubr.msk.bf16.mxu0 %vm966_vm2, %v965_v3 }
 0x2c1   :  { %863 = vmatprep.subr.bf16.mxu0 %v965_v3 }
 0x392   :  { %v221_v47 = vpop.f32.mrb[4].mxu0 }
 0x393   :  { %v237_v48 = vadd.f32 %v221_v47, %v1051_v15  ;;  %v843_v49 = vpop.f32.mrb[5].mxu0  ;;  %v228_v53 = vrot.slane %v221_v47, 4 }
 0x394   :  { %v224_v50 = vpop.f32.mrb[6].mxu0 }
 0x395   :  { %v239_v51 = vrot.slane %v237_v48, 4  ;;  %v844_v52 = vpop.f32.mrb[7].mxu0  ;;  %v230_v54 = vadd.f32 %v228_v53, %v83_v29 }
 0x397   :  { %240 = vrot.lane.b32.xlu1 %v239_v51, %s969_s8  ;;  %v795_v55 = vmul.f32 -1.442695, %v230_v54 }
 0x399   :  { %899 = vpow2.f32 %v795_v55 }
 0x3a3   :  { %v900_v56 = vpop.eup %899 }
 0x3a4   :  { %v234_v57 = vadd.f32 1.0, %v900_v56 }
 0x3a6   :  { %901 = vrcp.f32 %v234_v57 }
 0x3b0   :  { %v902_v58 = vpop.eup %901 }
 0x3b1   :  { %v250_v0 = vsub.f32 1.0, %v902_v58  ;;  %v259_v4 = vmul.f32 %v902_v58, %v257_v1 }
 0x409   :  { %v241_v59 = vpop.permute.xlu1 %240 }
 0x40a   :  { %v243_v60 = vmul.f32 %v902_v58, %v241_v59 }
 0x40c   :  { %245 = vrot.lane.b32.xlu0 %v243_v60, %s967_s7 }
 0x47e   :  { %v246_v61 = vpop.permute.xlu0 %245 }
 0x47f   :  { %v248_v62 = vadd.f32 %v246_v61, %v83_v29 }
 0x481   :  { %903 = vtanh.f32 %v248_v62 }
 0x48b   :  { %v904_v63 = vpop.eup %903 }
 0x48c   :  { %252 = vrot.lane.b32.xlu1 %v904_v63, %s970_s3 }
 0x4fe   :  { %v253_v2 = vpop.permute.xlu1 %252 }
 0x4ff   :  { %v255_v6 = vmul.f32 %v253_v2, %v250_v0 }
 0x501   :  { %v1081_v7 = vadd.f32 %v259_v4, %v255_v6 }
 0x503   :  { %v261_v8 = vpack.c.bf16 %v1081_v7, %v1081_v7  ;;  %v335_v30 = vrot.slane %v1081_v7, 4 }
 0x505   :  { %v263_v9 = vrot.slane %v261_v8, 2 }
 0x507   :  { %264 = vrot.lane.b32.xlu0 %v263_v9, %s970_s3 }
 0x579   :  { %v265_v10 = vpop.permute.xlu0 %264 }
 0x57a   :  { %848 = vmatmul.mubr.msk.bf16.vlgmr.msra.gmra.mrb[4].mxu1 %vm106_vm3, %v265_v10 }
 0x57b   :  { %858 = vmatpush3.bf16.msra.mxu1 %v1016_v5  ;;  %859 = vmatprep.mubr.msk.bf16.mxu1 %vm966_vm2, %v965_v3 }
 0x57c   :  { %869 = vmatprep.subr.bf16.mxu1 %v965_v3 }
 0x64d   :  { %v303_v11 = vpop.f32.mrb[4].mxu1 }
 0x64e   :  { %v316_v12 = vadd.f32 %v303_v11, %v1051_v15  ;;  %v849_v13 = vpop.f32.mrb[5].mxu1  ;;  %v309_v17 = vadd.f32 %v303_v11, %v1062_v28 }
 0x64f   :  { %v306_v14 = vpop.f32.mrb[6].mxu1 }
 0x650   :  { %318 = vrot.lane.b32.xlu1 %v316_v12, %s969_s8  ;;  %v850_v16 = vpop.f32.mrb[7].mxu1  ;;  %v797_v18 = vmul.f32 -1.442695, %v309_v17 }
 0x652   :  { %905 = vpow2.f32 %v797_v18 }
 0x65c   :  { %v906_v19 = vpop.eup %905 }
 0x65d   :  { %v313_v20 = vadd.f32 1.0, %v906_v19 }
 0x65f   :  { %907 = vrcp.f32 %v313_v20 }
 0x669   :  { %v908_v22 = vpop.eup %907 }
 0x66a   :  { %v328_v31 = vsub.f32 1.0, %v908_v22  ;;  %v337_v33 = vmul.f32 %v908_v22, %v335_v30 }
 0x6c2   :  { %v319_v23 = vpop.permute.xlu1 %318 }
 0x6c3   :  { %v321_v24 = vmul.f32 %v908_v22, %v319_v23 }
 0x6c5   :  { %323 = vrot.lane.b32.xlu0 %v321_v24, %s967_s7 }
 0x737   :  { %v324_v25 = vpop.permute.xlu0 %323 }
 0x738   :  { %v326_v27 = vadd.f32 %v324_v25, %v1062_v28 }
 0x73a   :  { %909 = vtanh.f32 %v326_v27 }
 0x744   :  { %v910_v29 = vpop.eup %909 }
 0x745   :  { %330 = vrot.lane.b32.xlu1 %v910_v29, %s970_s3 }
 0x7b7   :  { %v331_v32 = vpop.permute.xlu1 %330 }
 0x7b8   :  { %v333_v34 = vmul.f32 %v331_v32, %v328_v31 }
 0x7ba   :  { %v1100_v35 = vadd.f32 %v337_v33, %v333_v34 }
 0x7bc   :  { %v339_v36 = vpack.c.bf16 %v1100_v35, %v1100_v35  ;;  %v416_v57 = vrot.slane %v1100_v35, 4 }
 0x7be   :  { %341 = vrot.lane.b32.xlu0 %v339_v36, %s970_s3 }
 0x830   :  { %v342_v37 = vpop.permute.xlu0 %341 }
 0x831   :  { %854 = vmatmul.mubr.msk.bf16.vlgmr.msra.gmra.mrb[8].mxu0 %vm106_vm3, %v342_v37 }
 0x832   :  { %864 = vmatpush3.bf16.msra.mxu0 %v1016_v5  ;;  %865 = vmatprep.mubr.msk.bf16.mxu0 %vm966_vm2, %v965_v3 }
 0x833   :  { %875 = vmatprep.subr.bf16.mxu0 %v965_v3 }
 0x904   :  { %v380_v38 = vpop.f32.mrb[8].mxu0 }
 0x905   :  { %v396_v39 = vadd.f32 %v380_v38, %v1051_v15  ;;  %v855_v40 = vpop.f32.mrb[9].mxu0  ;;  %v387_v45 = vrot.slane %v380_v38, 4 }
 0x906   :  { %v383_v41 = vpop.f32.mrb[10].mxu0 }
 0x907   :  { %v398_v42 = vrot.slane %v396_v39, 4  ;;  %v856_v43 = vpop.f32.mrb[11].mxu0  ;;  %v389_v46 = vadd.f32 %v387_v45, %v1062_v28 }
 0x909   :  { %399 = vrot.lane.b32.xlu1 %v398_v42, %s969_s8  ;;  %v799_v47 = vmul.f32 -1.442695, %v389_v46 }
 0x90b   :  { %911 = vpow2.f32 %v799_v47 }
 0x915   :  { %v912_v48 = vpop.eup %911 }
 0x916   :  { %v393_v49 = vadd.f32 1.0, %v912_v48 }
 0x918   :  { %913 = vrcp.f32 %v393_v49 }
 0x922   :  { %v914_v50 = vpop.eup %913 }
 0x923   :  { %v409_v56 = vsub.f32 1.0, %v914_v50  ;;  %v418_v59 = vmul.f32 %v914_v50, %v416_v57 }
 0x97b   :  { %v400_v51 = vpop.permute.xlu1 %399 }
 0x97c   :  { %v402_v52 = vmul.f32 %v914_v50, %v400_v51 }
 0x97e   :  { %404 = vrot.lane.b32.xlu0 %v402_v52, %s967_s7 }
 0x9f0   :  { %v405_v53 = vpop.permute.xlu0 %404 }
 0x9f1   :  { %v407_v54 = vadd.f32 %v405_v53, %v1062_v28 }
 0x9f3   :  { %915 = vtanh.f32 %v407_v54 }
 0x9fd   :  { %v916_v55 = vpop.eup %915 }
 0x9fe   :  { %411 = vrot.lane.b32.xlu1 %v916_v55, %s970_s3 }
 0xa70   :  { %v412_v58 = vpop.permute.xlu1 %411 }
 0xa71   :  { %v414_v60 = vmul.f32 %v412_v58, %v409_v56 }
 0xa73   :  { %v1117_v61 = vadd.f32 %v418_v59, %v414_v60 }
 0xa75   :  { %v420_v62 = vpack.c.bf16 %v1117_v61, %v1117_v61  ;;  %v494_v19 = vrot.slane %v1117_v61, 4 }
 0xa77   :  { %v422_v63 = vrot.slane %v420_v62, 2 }
 0xa79   :  { %423 = vrot.lane.b32.xlu0 %v422_v63, %s970_s3 }
 0xaeb   :  { %v424_v0 = vpop.permute.xlu0 %423 }
 0xaec   :  { %860 = vmatmul.mubr.msk.bf16.vlgmr.msra.gmra.mrb[8].mxu1 %vm106_vm3, %v424_v0 }
 0xaed   :  { %870 = vmatpush3.bf16.msra.mxu1 %v1016_v5  ;;  %871 = vmatprep.mubr.msk.bf16.mxu1 %vm966_vm2, %v965_v3 }
 0xbbf   :  { %v462_v28 = vpop.f32.mrb[8].mxu1 }
 0xbc0   :  { %v475_v1 = vadd.f32 %v462_v28, %v1051_v15  ;;  %v861_v2 = vpop.f32.mrb[9].mxu1  ;;  %v468_v8 = vadd.f32 %v462_v28, %v1057_v21 }
 0xbc1   :  { %v465_v4 = vpop.f32.mrb[10].mxu1 }
 0xbc2   :  { %477 = vrot.lane.b32.xlu1 %v475_v1, %s969_s8  ;;  %v862_v6 = vpop.f32.mrb[11].mxu1  ;;  %v801_v9 = vmul.f32 -1.442695, %v468_v8 }
 0xbc4   :  { %917 = vpow2.f32 %v801_v9 }
 0xbce   :  { %v918_v10 = vpop.eup %917 }
 0xbcf   :  { %v472_v11 = vadd.f32 1.0, %v918_v10 }
 0xbd1   :  { %919 = vrcp.f32 %v472_v11 }
 0xbdb   :  { %v920_v12 = vpop.eup %919 }
 0xbdc   :  { %v487_v20 = vsub.f32 1.0, %v920_v12  ;;  %v496_v23 = vmul.f32 %v920_v12, %v494_v19 }
 0xc34   :  { %v478_v13 = vpop.permute.xlu1 %477 }
 0xc35   :  { %v480_v14 = vmul.f32 %v920_v12, %v478_v13 }
 0xc37   :  { %482 = vrot.lane.b32.xlu0 %v480_v14, %s967_s7 }
 0xca9   :  { %v483_v16 = vpop.permute.xlu0 %482 }
 0xcaa   :  { %v485_v17 = vadd.f32 %v483_v16, %v1057_v21 }
 0xcac   :  { %921 = vtanh.f32 %v485_v17 }
 0xcb6   :  { %v922_v18 = vpop.eup %921 }
 0xcb7   :  { %489 = vrot.lane.b32.xlu1 %v922_v18, %s970_s3 }
 0xd29   :  { %v490_v22 = vpop.permute.xlu1 %489 }
 0xd2a   :  { %v492_v24 = vmul.f32 %v490_v22, %v487_v20 }
 0xd2c   :  { %v1135_v25 = vadd.f32 %v496_v23, %v492_v24 }
 0xd2e   :  { %v498_v27 = vpack.c.bf16 %v1135_v25, %v1135_v25  ;;  %v575_v49 = vrot.slane %v1135_v25, 4 }
 0xd30   :  { %500 = vrot.lane.b32.xlu0 %v498_v27, %s970_s3 }
 0xda2   :  { %v501_v29 = vpop.permute.xlu0 %500 }
 0xda3   :  { %866 = vmatmul.mubr.msk.bf16.vlgmr.msra.gmra.mrb[12].mxu0 %vm106_vm3, %v501_v29 }
 0xda4   :  { %876 = vmatpush3.bf16.msra.mxu0 %v1016_v5  ;;  %877 = vmatprep.mubr.msk.bf16.mxu0 %vm966_vm2, %v965_v3 }
 0xe76   :  { %v539_v31 = vpop.f32.mrb[12].mxu0 }
 0xe77   :  { %v555_v32 = vadd.f32 %v539_v31, %v1051_v15  ;;  %v867_v33 = vpop.f32.mrb[13].mxu0  ;;  %v546_v38 = vrot.slane %v539_v31, 4 }
 0xe78   :  { %v542_v34 = vpop.f32.mrb[14].mxu0 }
 0xe79   :  { %v557_v36 = vrot.slane %v555_v32, 4  ;;  %v868_v37 = vpop.f32.mrb[15].mxu0  ;;  %v548_v39 = vadd.f32 %v546_v38, %v1057_v21 }
 0xe7b   :  { %558 = vrot.lane.b32.xlu1 %v557_v36, %s969_s8  ;;  %v803_v40 = vmul.f32 -1.442695, %v548_v39 }
 0xe7d   :  { %923 = vpow2.f32 %v803_v40 }
 0xe87   :  { %v924_v41 = vpop.eup %923 }
 0xe88   :  { %v552_v42 = vadd.f32 1.0, %v924_v41 }
 0xe8a   :  { %925 = vrcp.f32 %v552_v42 }
 0xe94   :  { %v926_v5 = vpop.eup %925 }
 0xe95   :  { %v568_v48 = vsub.f32 1.0, %v926_v5  ;;  %v577_v51 = vmul.f32 %v926_v5, %v575_v49 }
 0xeed   :  { %v559_v43 = vpop.permute.xlu1 %558 }
 0xeee   :  { %v561_v3 = vmul.f32 %v926_v5, %v559_v43 }
 0xef0   :  { %563 = vrot.lane.b32.xlu0 %v561_v3, %s967_s7 }
 0xf62   :  { %v564_v45 = vpop.permute.xlu0 %563 }
 0xf63   :  { %v566_v46 = vadd.f32 %v564_v45, %v1057_v21 }
 0xf65   :  { %927 = vtanh.f32 %v566_v46 }
 0xf6f   :  { %v928_v47 = vpop.eup %927 }
 0xf70   :  { %570 = vrot.lane.b32.xlu1 %v928_v47, %s970_s3 }
 0xfe2   :  { %v571_v50 = vpop.permute.xlu1 %570 }
 0xfe3   :  { %v573_v52 = vmul.f32 %v571_v50, %v568_v48 }
 0xfe5   :  { %v578_v53 = vadd.f32 %v577_v51, %v573_v52 }
 0xfe7   :  { %v579_v54 = vpack.c.bf16 %v578_v53, %v578_v53  ;;  %v653_v10 = vrot.slane %v578_v53, 4 }
 0xfe9   :  { %v581_v55 = vrot.slane %v579_v54, 2 }
 0xfeb   :  { %582 = vrot.lane.b32.xlu0 %v581_v55, %s970_s3 }
0x105d   :  { %v583_v56 = vpop.permute.xlu0 %582 }
0x105e   :  { %872 = vmatmul.mubr.msk.bf16.vlgmr.msra.gmra.mrb[12].mxu1 %vm106_vm3, %v583_v56 }
0x1131   :  { %v621_v57 = vpop.f32.mrb[12].mxu1 }
0x1132   :  { %v634_v21 = vadd.f32 %v621_v57, %v1051_v15  ;;  %v873_v58 = vpop.f32.mrb[13].mxu1  ;;  %v627_v62 = vadd.f32 %v621_v57, %v1060_v26 }
0x1133   :  { %v624_v59 = vpop.f32.mrb[14].mxu1 }
0x1134   :  { %636 = vrot.lane.b32.xlu1 %v634_v21, %s969_s8  ;;  %v874_v60 = vpop.f32.mrb[15].mxu1  ;;  %v805_v63 = vmul.f32 -1.442695, %v627_v62 }
0x1136   :  { %929 = vpow2.f32 %v805_v63 }
0x1140   :  { %v930_v0 = vpop.eup %929 }
0x1141   :  { %v631_v28 = vadd.f32 1.0, %v930_v0 }
0x1143   :  { %931 = vrcp.f32 %v631_v28 }
0x114d   :  { %v932_v1 = vpop.eup %931 }
0x114e   :  { %v646_v11 = vsub.f32 1.0, %v932_v1  ;;  %v655_v13 = vmul.f32 %v932_v1, %v653_v10 }
0x11a6   :  { %v637_v2 = vpop.permute.xlu1 %636 }
0x11a7   :  { %v639_v4 = vmul.f32 %v932_v1, %v637_v2 }
0x11a9   :  { %641 = vrot.lane.b32.xlu0 %v639_v4, %s967_s7 }
0x121b   :  { %v642_v6 = vpop.permute.xlu0 %641 }
0x121c   :  { %v644_v8 = vadd.f32 %v642_v6, %v1060_v26 }
0x121e   :  { %933 = vtanh.f32 %v644_v8 }
0x1228   :  { %v934_v9 = vpop.eup %933 }
0x1229   :  { %648 = vrot.lane.b32.xlu1 %v934_v9, %s970_s3 }
0x129b   :  { %v649_v12 = vpop.permute.xlu1 %648 }
0x129c   :  { %v651_v14 = vmul.f32 %v649_v12, %v646_v11 }
0x129e   :  { %v656_v16 = vadd.f32 %v655_v13, %v651_v14 }
0x12a0   :  { %v657_v17 = vpack.c.bf16 %v656_v16, %v656_v16  ;;  %v734_v61 = vrot.slane %v656_v16, 4 }
0x12a2   :  { %659 = vrot.lane.b32.xlu0 %v657_v17, %s970_s3 }
0x1314   :  { %v660_v18 = vpop.permute.xlu0 %659 }
0x1315   :  { %878 = vmatmul.mubr.msk.bf16.vlgmr.msra.gmra.mrb[16].mxu0 %vm106_vm3, %v660_v18 }
0x13e8   :  { %v698_v20 = vpop.f32.mrb[16].mxu0 }
0x13e9   :  { %v714_v22 = vadd.f32 %v698_v20, %v1051_v15  ;;  %v879_v23 = vpop.f32.mrb[17].mxu0  ;;  %v705_v31 = vrot.slane %v698_v20, 4 }
0x13ea   :  { %v701_v24 = vpop.f32.mrb[18].mxu0 }
0x13eb   :  { %v716_v27 = vrot.slane %v714_v22, 4  ;;  %v880_v29 = vpop.f32.mrb[19].mxu0  ;;  %v707_v32 = vadd.f32 %v705_v31, %v1060_v26 }
0x13ed   :  { %717 = vrot.lane.b32.xlu1 %v716_v27, %s969_s8  ;;  %v807_v33 = vmul.f32 -1.442695, %v707_v32 }
0x13ef   :  { %935 = vpow2.f32 %v807_v33 }
0x13f9   :  { %v936_v34 = vpop.eup %935 }
0x13fa   :  { %v711_v36 = vadd.f32 1.0, %v936_v34 }
0x13fc   :  { %937 = vrcp.f32 %v711_v36 }
0x1406   :  { %v938_v37 = vpop.eup %937 }
0x1407   :  { %v736_v42 = vmul.f32 %v938_v37, %v734_v61 }
0x145f   :  { %v718_v38 = vpop.permute.xlu1 %717 }
0x1460   :  { %v720_v39 = vmul.f32 %v938_v37, %v718_v38 }
0x1462   :  { %722 = vrot.lane.b32.xlu0 %v720_v39, %s967_s7 }
0x1466   :  { %738 = vrot.lane.b32.xlu0 %v1066_v44, %s970_s3  ;;  %v727_v44 = vsub.f32 1.0, %v938_v37 }
0x146a   :  { %744 = vrot.lane.b32.xlu0 %v494_v19, %s967_s7 }
0x146e   :  { %750 = vrot.lane.b32.xlu0 %v653_v10, %s971_s9 }
0x14d4   :  { %v723_v15 = vpop.permute.xlu0 %722 }
0x14d5   :  { %v725_v40 = vadd.f32 %v723_v15, %v1060_v26 }
0x14d7   :  { %939 = vtanh.f32 %v725_v40 }
0x14d8   :  { %v739_v26 = vpop.permute.xlu0 %738 }
0x14dc   :  { %v745_v46 = vpop.permute.xlu0 %744 }
0x14e0   :  { %v751_v49 = vpop.permute.xlu0 %750 }
0x14e1   :  { %v940_v41 = vpop.eup %939 }
0x14e2   :  { %729 = vrot.lane.b32.xlu1 %v940_v41, %s970_s3 }
0x14e6   :  { %741 = vrot.lane.b32.xlu1 %v1100_v35, %s972_s10  ;;  %v761_v35 = vsel %vm106_vm3, %v739_v26, %v335_v30 }
0x14ea   :  { %747 = vrot.lane.b32.xlu1 %v1135_v25, %s973_s11 }
0x14ee   :  { %753 = vrot.lane.b32.xlu1 %v656_v16, %s974_s12 }
0x1554   :  { %v730_v19 = vpop.permute.xlu1 %729 }
0x1555   :  { %v732_v5 = vmul.f32 %v730_v19, %v727_v44 }
0x1557   :  { %v737_v43 = vadd.f32 %v736_v42, %v732_v5 }
0x1558   :  { %v742_v45 = vpop.permute.xlu1 %741 }
0x1559   :  { %v757_v3 = vrot.slane %v737_v43, 4  ;;  %v763_v47 = vsel %vm762_vm4, %v761_v35, %v742_v45 }
0x155a   :  { %v765_v48 = vsel %vm764_vm5, %v763_v47, %v745_v46 }
0x155b   :  { %758 = vrot.lane.b32.xlu0 %v757_v3, %s969_s8 }
0x155c   :  { %v748_v25 = vpop.permute.xlu1 %747 }
0x155d   :  { %v767_v50 = vsel %vm766_vm6, %v765_v48, %v748_v25 }
0x155e   :  { %v769_v52 = vsel %vm768_vm7, %v767_v50, %v751_v49 }
0x1560   :  { %v754_v51 = vpop.permute.xlu1 %753 }
0x1561   :  { %v771_v53 = vsel %vm770_vm8, %v769_v52, %v754_v51 }
0x15cd   :  { %v759_v54 = vpop.permute.xlu0 %758 }
0x15ce   :  { %v773_v7 = vsel %vm772_vm9, %v771_v53, %v759_v54 }
0x15cf   :  { %774 = vst [vmem:[#allocation2] sm:$0xf] %v773_v7 }
0x15d0   :  { %952 = shalt.err (!%p949_p4)
}
0x15d1   :  { %s953_s18 = scalar_lea.hbm %s1195_s5, 64 }
0x15d2   :  { %p954_p5 = scmp.ne.s32.totalorder %s1195_s5, %s953_s18  ;;  %p957_p6 = scmp.lt.u32.totalorder %s953_s18, %s1195_s5 }
0x15d4   :  { %p959_p7 = pnand %p957_p6, %p954_p5 }
0x15d6   :  { %962 = shalt.err (!%p959_p7)
}
0x15d7   :  { %784 = dma.vmem_to_hbm [thread:$0]  %s782_s14, 64, %s1195_s5, [#allocation3]  }
0x15d8   :  { %963 = dma.done.wait [#allocation3], 64  }
0x15d9   :  { %964 = vsyncadd [#allocation3], 4294967232 }
0x15da   :  { %788 = vsyncpa [#allocation3], 1 }

</bundles_post_ra>
